<compile_context>
chip_gen: v5e
topology: v5e:2x2
jax: 0.10.0
libtpu: 0.0.40
codegen_flags: <defaults>
</compile_context>

<pallas_src>
import functools

import jax
import jax.numpy as jnp
from jax.experimental import pallas as pl
from jax.experimental.pallas import tpu as pltpu


def _self_attention_kernel(h_ref, wqkv_ref, bqkv_ref, o_ref, *, d, kv_tile):
    bt, s, _ = h_ref.shape
    in_dtype = h_ref.dtype

    # (Bt, S, D) -> (Bt*S, D): sublane-dim merge (free when S % 8 == 0).
    h2 = h_ref[...].reshape(bt * s, d)

    def project(idx):
        # Leading-axis slice of the stacked weight: a free view, no lane relayout.
        r = jnp.dot(h2, wqkv_ref[idx], preferred_element_type=jnp.float32)
        r = r + bqkv_ref[idx].astype(jnp.float32)           # (Bt*S, D) f32
        # Drop back to the input dtype for the attention matmuls (bf16-ready);
        # no-op for f32 inputs.
        return r.astype(in_dtype).reshape(bt, s, d)

    q = project(0)      # 1/sqrt(D) already folded into wqkv[0] / bqkv[0]
    k = project(1)
    v = project(2)

    # Flash-style KV tiling with an online softmax: scores/p are only (Bt, S, kv_tile).
    # Static Python unroll (kv_tile divides S; wrapper guarantees it).
    nkv = s // kv_tile
    m_run = None
    l_run = None
    acc = None
    for j in range(nkv):
        kj = k[:, j * kv_tile:(j + 1) * kv_tile, :]
        vj = v[:, j * kv_tile:(j + 1) * kv_tile, :]
        # Contract last dims directly (no k.T / XLU transpose); f32 accumulation.
        s_blk = jnp.einsum("bqd,bkd->bqk", q, kj,
                           preferred_element_type=jnp.float32)     # (Bt,S,kv_tile)
        m_blk = jnp.max(s_blk, axis=-1, keepdims=True)
        if j == 0:
            m_run = m_blk
            p = jnp.exp(s_blk - m_run)
            l_run = jnp.sum(p, axis=-1, keepdims=True)
            acc = jnp.einsum("bqk,bkd->bqd", p.astype(vj.dtype), vj,
                             preferred_element_type=jnp.float32)
        else:
            m_new = jnp.maximum(m_run, m_blk)
            alpha = jnp.exp(m_run - m_new)
            p = jnp.exp(s_blk - m_new)
            l_run = alpha * l_run + jnp.sum(p, axis=-1, keepdims=True)
            acc = alpha * acc + jnp.einsum("bqk,bkd->bqd", p.astype(vj.dtype), vj,
                                           preferred_element_type=jnp.float32)
            m_run = m_new

    # Dropout: eval-mode identity.

    # Deferred normalization with an exact reciprocal (only (Bt, S, 1) elements).
    o = acc * pl.reciprocal(l_run)
    o_ref[...] = o.astype(o_ref.dtype)


def prepare_params(Wq, bq, Wk, bk, Wv, bv):
    """Build the stacked, pre-scaled QKV parameters ONCE at parameter-load time.

    PyTorch Linear computes x @ W.T + b; 1/sqrt(D) from the attention scale is
    folded into the Q projection so the kernel never multiplies the scores.
    """
    D = Wq.shape[0]
    inv_scale = 1.0 / (float(D) ** 0.5)
    Wqkv = jnp.stack([Wq.T * inv_scale, Wk.T, Wv.T], axis=0)          # (3, D, D)
    bqkv = jnp.stack([bq * inv_scale, bk, bv], axis=0).reshape(3, 1, D)
    return Wqkv, bqkv


def _pick_block_b(B, S, row_target, min_grid):
    # Keep the grid at >= min(min_grid, B) steps (pipelining + v7x 2-TC sharding),
    # and within that constraint pick the smallest batch tile that still fills the
    # MXU M dimension (row_target rows); otherwise take the largest allowed tile.
    divisors = [d for d in range(1, B + 1) if B % d == 0]
    grid_floor = min(min_grid, B)
    allowed = [d for d in divisors if (B // d) >= grid_floor] or [1]
    filled = [d for d in allowed if d * S >= row_target]
    return min(filled) if filled else max(allowed)


def _pick_kv_tile(S, kv_block):
    for cand in range(min(S, kv_block), 0, -1):
        if S % cand == 0:
            return cand
    return S


def _vmem_limit_bytes(block_b, S, D, kv_tile, itemsize):
    """Rough per-step VMEM footprint (lane-padded), with margin and sane clamps."""
    rows = block_b * S
    lane_d = max(D, 128)
    io_tiles = 2 * 2 * rows * lane_d * itemsize               # H + O blocks, double-buffered
    weights = 3 * D * lane_d * itemsize + 3 * 8 * lane_d * itemsize
    proj = 3 * rows * lane_d * (4 + itemsize)                 # f32 projections + q/k/v casts
    attn = 2 * block_b * S * max(kv_tile, 128) * 4 + 2 * rows * lane_d * 4
    est = io_tiles + weights + proj + attn
    return int(min(max(2 * est, 16 * 2 ** 20), 64 * 2 ** 20))


def self_attention(H, Wqkv, bqkv, *, block_b=None, kv_block=512,
                   row_target=512, min_grid=4):
    """H: [B, S, D]; (Wqkv, bqkv) from prepare_params().

    row_target: rows of the projection matmul per grid step (MXU M fill).
      512 suits v6e/v7x's 256-wide MXU; use ~128-256 on v5e to cut VMEM pressure.
    """
    B, S, D = H.shape
    assert Wqkv.shape == (3, D, D) and bqkv.shape == (3, 1, D)

    if block_b is None:
        block_b = _pick_block_b(B, S, row_target, min_grid)
    assert B % block_b == 0
    kv_tile = _pick_kv_tile(S, kv_block)

    kernel = functools.partial(_self_attention_kernel, d=D, kv_tile=kv_tile)
    vmem_limit = _vmem_limit_bytes(block_b, S, D, kv_tile, H.dtype.itemsize)

    def build(single_buffer_weights):
        # Constant index_map -> the weight DMA is issued once; single-buffering it
        # halves the largest resident allocation for production-sized D.
        w_kwargs = {"pipeline_mode": pl.Buffered(1)} if single_buffer_weights else {}
        return pl.pallas_call(
            kernel,
            out_shape=jax.ShapeDtypeStruct((B, S, D), H.dtype),
            grid=(B // block_b,),
            in_specs=[
                pl.BlockSpec((block_b, S, D), lambda i: (i, 0, 0)),          # H tile
                pl.BlockSpec((3, D, D), lambda i: (0, 0, 0), **w_kwargs),    # stacked Wqkv
                pl.BlockSpec((3, 1, D), lambda i: (0, 0, 0), **w_kwargs),    # stacked bias
            ],
            out_specs=pl.BlockSpec((block_b, S, D), lambda i: (i, 0, 0)),
            compiler_params=pltpu.CompilerParams(
                dimension_semantics=("parallel",),        # shards across v7x's 2 TCs
                vmem_limit_bytes=vmem_limit),
        )

    try:
        return build(True)(H, Wqkv, bqkv)
    except Exception:
        # Fallback for jax builds without BlockSpec pipeline_mode support.
        return build(False)(H, Wqkv, bqkv)


def _reference(H, Wq, bq, Wk, bk, Wv, bv):
    D = H.shape[-1]
    Q = H @ Wq.T + bq
    K = H @ Wk.T + bk
    V = H @ Wv.T + bv
    scores = jnp.einsum("bqd,bkd->bqk", Q, K) / (D ** 0.5)
    p = jax.nn.softmax(scores, axis=-1)
    return jnp.einsum("bqk,bkd->bqd", p, V)


if __name__ == "__main__":
    B, S, D = 2, 8, 32
    key = jax.random.PRNGKey(0)
    kh, kwq, kbq, kwk, kbk, kwv, kbv = jax.random.split(key, 7)

    H = jax.random.normal(kh, (B, S, D), dtype=jnp.float32)
    # Deterministic parameter init (uniform like PyTorch Linear default range).
    bound = 1.0 / (D ** 0.5)
    Wq = jax.random.uniform(kwq, (D, D), jnp.float32, -bound, bound)
    bq = jax.random.uniform(kbq, (D,), jnp.float32, -bound, bound)
    Wk = jax.random.uniform(kwk, (D, D), jnp.float32, -bound, bound)
    bk = jax.random.uniform(kbk, (D,), jnp.float32, -bound, bound)
    Wv = jax.random.uniform(kwv, (D, D), jnp.float32, -bound, bound)
    bv = jax.random.uniform(kbv, (D,), jnp.float32, -bound, bound)

    # Parameter prep hoisted out of the forward path (done once at load time).
    Wqkv, bqkv = prepare_params(Wq, bq, Wk, bk, Wv, bv)

    out = self_attention(H, Wqkv, bqkv)
    out = jax.block_until_ready(out)

    ref = _reference(H, Wq, bq, Wk, bk, Wv, bv)
    assert out.shape == (B, S, D)
    # Conservative tolerance: both kernel and reference run their f32 matmuls through
    # the MXU at default precision (the approx reciprocal has been removed).
    assert jnp.allclose(out, ref, atol=2e-3, rtol=2e-3), "mismatch vs reference"
    print("KERNEL_OK")
</pallas_src>

<mosaic_0001>
module attributes {stable_mosaic.version = 11 : i64} {
  func.func @_self_attention_kernel(%arg0: i32, %arg1: memref<1x8x32xf32, #tpu.memory_space<vmem>>, %arg2: memref<3x32x32xf32, #tpu.memory_space<vmem>>, %arg3: memref<3x1x32xf32, #tpu.memory_space<vmem>>, %arg4: memref<1x8x32xf32, #tpu.memory_space<vmem>>) attributes {dimension_semantics = [#tpu.dimension_semantics<parallel>], iteration_bounds = array<i64: 2>, scalar_prefetch = 0 : i64, scratch_operands = 0 : i64, tpu.core_type = #tpu.core_type<tc>, window_params = [{transform_indices = @transform_0, window_bounds = array<i64: 1, 8, 32>}, {pipeline_mode = #tpu.pipeline_mode<synchronous>, transform_indices = @transform_1, window_bounds = array<i64: 3, 32, 32>}, {pipeline_mode = #tpu.pipeline_mode<synchronous>, transform_indices = @transform_2, window_bounds = array<i64: 3, 1, 32>}, {transform_indices = @transform_3, window_bounds = array<i64: 1, 8, 32>}]} {
    %c0 = arith.constant 0 : index
    %c0_0 = arith.constant 0 : index
    %c0_1 = arith.constant 0 : index
    %0 = vector.load %arg1[%c0, %c0_0, %c0_1] : memref<1x8x32xf32, #tpu.memory_space<vmem>>, vector<1x8x32xf32>
    %1 = vector.shape_cast %0 : vector<1x8x32xf32> to vector<8x32xf32>
    %c0_2 = arith.constant 0 : index
    %c0_3 = arith.constant 0 : index
    %c0_4 = arith.constant 0 : index
    %2 = vector.load %arg2[%c0_2, %c0_3, %c0_4] : memref<3x32x32xf32, #tpu.memory_space<vmem>>, vector<1x32x32xf32>
    %3 = vector.shape_cast %2 : vector<1x32x32xf32> to vector<32x32xf32>
    %cst = arith.constant dense<0.000000e+00> : vector<8x32xf32>
    %4 = tpu.matmul %1, %3, %cst {dimension_numbers = #tpu.dot_dimension_numbers<[1], [0], [0], [1], [0, 0, 1, 1], [], []>} : vector<8x32xf32>, vector<32x32xf32>, vector<8x32xf32> -> vector<8x32xf32>
    %c0_5 = arith.constant 0 : index
    %c0_6 = arith.constant 0 : index
    %c0_7 = arith.constant 0 : index
    %5 = vector.load %arg3[%c0_5, %c0_6, %c0_7] : memref<3x1x32xf32, #tpu.memory_space<vmem>>, vector<1x1x32xf32>
    %6 = vector.shape_cast %5 : vector<1x1x32xf32> to vector<1x32xf32>
    %7 = vector.broadcast %6 : vector<1x32xf32> to vector<8x32xf32>
    %8 = arith.addf %4, %7 : vector<8x32xf32>
    %9 = vector.shape_cast %8 : vector<8x32xf32> to vector<1x8x32xf32>
    %c1 = arith.constant 1 : index
    %c0_8 = arith.constant 0 : index
    %c0_9 = arith.constant 0 : index
    %10 = vector.load %arg2[%c1, %c0_8, %c0_9] : memref<3x32x32xf32, #tpu.memory_space<vmem>>, vector<1x32x32xf32>
    %11 = vector.shape_cast %10 : vector<1x32x32xf32> to vector<32x32xf32>
    %cst_10 = arith.constant dense<0.000000e+00> : vector<8x32xf32>
    %12 = tpu.matmul %1, %11, %cst_10 {dimension_numbers = #tpu.dot_dimension_numbers<[1], [0], [0], [1], [0, 0, 1, 1], [], []>} : vector<8x32xf32>, vector<32x32xf32>, vector<8x32xf32> -> vector<8x32xf32>
    %c1_11 = arith.constant 1 : index
    %c0_12 = arith.constant 0 : index
    %c0_13 = arith.constant 0 : index
    %13 = vector.load %arg3[%c1_11, %c0_12, %c0_13] : memref<3x1x32xf32, #tpu.memory_space<vmem>>, vector<1x1x32xf32>
    %14 = vector.shape_cast %13 : vector<1x1x32xf32> to vector<1x32xf32>
    %15 = vector.broadcast %14 : vector<1x32xf32> to vector<8x32xf32>
    %16 = arith.addf %12, %15 : vector<8x32xf32>
    %17 = vector.shape_cast %16 : vector<8x32xf32> to vector<1x8x32xf32>
    %c2 = arith.constant 2 : index
    %c0_14 = arith.constant 0 : index
    %c0_15 = arith.constant 0 : index
    %18 = vector.load %arg2[%c2, %c0_14, %c0_15] : memref<3x32x32xf32, #tpu.memory_space<vmem>>, vector<1x32x32xf32>
    %19 = vector.shape_cast %18 : vector<1x32x32xf32> to vector<32x32xf32>
    %cst_16 = arith.constant dense<0.000000e+00> : vector<8x32xf32>
    %20 = tpu.matmul %1, %19, %cst_16 {dimension_numbers = #tpu.dot_dimension_numbers<[1], [0], [0], [1], [0, 0, 1, 1], [], []>} : vector<8x32xf32>, vector<32x32xf32>, vector<8x32xf32> -> vector<8x32xf32>
    %c2_17 = arith.constant 2 : index
    %c0_18 = arith.constant 0 : index
    %c0_19 = arith.constant 0 : index
    %21 = vector.load %arg3[%c2_17, %c0_18, %c0_19] : memref<3x1x32xf32, #tpu.memory_space<vmem>>, vector<1x1x32xf32>
    %22 = vector.shape_cast %21 : vector<1x1x32xf32> to vector<1x32xf32>
    %23 = vector.broadcast %22 : vector<1x32xf32> to vector<8x32xf32>
    %24 = arith.addf %20, %23 : vector<8x32xf32>
    %25 = vector.shape_cast %24 : vector<8x32xf32> to vector<1x8x32xf32>
    "tpu.trace_start"() <{level = 10 : i32, message = "bqd,bkd->bqk"}> : () -> ()
    %cst_20 = arith.constant dense<0.000000e+00> : vector<1x8x8xf32>
    %26 = tpu.matmul %9, %17, %cst_20 {dimension_numbers = #tpu.dot_dimension_numbers<[2], [2], [1], [1], [0, 0, 0, 1, 1, 1], [0], [0]>} : vector<1x8x32xf32>, vector<1x8x32xf32>, vector<1x8x8xf32> -> vector<1x8x8xf32>
    "tpu.trace_stop"() : () -> ()
    %cst_21 = arith.constant dense<0xFF800000> : vector<1x8xf32>
    %27 = vector.multi_reduction <maximumf>, %26, %cst_21 [2] : vector<1x8x8xf32> to vector<1x8xf32>
    %28 = vector.shape_cast %27 : vector<1x8xf32> to vector<1x8x1xf32>
    %29 = vector.broadcast %28 : vector<1x8x1xf32> to vector<1x8x8xf32>
    %30 = arith.subf %26, %29 : vector<1x8x8xf32>
    %31 = math.exp %30 : vector<1x8x8xf32>
    %cst_22 = arith.constant dense<0.000000e+00> : vector<1x8xf32>
    %32 = vector.multi_reduction <add>, %31, %cst_22 [2] : vector<1x8x8xf32> to vector<1x8xf32>
    %33 = vector.shape_cast %32 : vector<1x8xf32> to vector<1x8x1xf32>
    "tpu.trace_start"() <{level = 10 : i32, message = "bqk,bkd->bqd"}> : () -> ()
    %cst_23 = arith.constant dense<0.000000e+00> : vector<1x8x32xf32>
    %34 = tpu.matmul %31, %25, %cst_23 {dimension_numbers = #tpu.dot_dimension_numbers<[2], [1], [1], [2], [0, 0, 0, 1, 1, 2], [0], [0]>} : vector<1x8x8xf32>, vector<1x8x32xf32>, vector<1x8x32xf32> -> vector<1x8x32xf32>
    "tpu.trace_stop"() : () -> ()
    %35 = tpu.reciprocal %33 : vector<1x8x1xf32> -> vector<1x8x1xf32>
    %36 = vector.broadcast %35 : vector<1x8x1xf32> to vector<1x8x32xf32>
    %37 = arith.mulf %34, %36 : vector<1x8x32xf32>
    %c0_24 = arith.constant 0 : index
    %c0_25 = arith.constant 0 : index
    %c0_26 = arith.constant 0 : index
    %38 = vector.load %arg4[%c0_24, %c0_25, %c0_26] : memref<1x8x32xf32, #tpu.memory_space<vmem>>, vector<1x8x32xf32>
    tpu.vector_store %arg4[%c0_24, %c0_25, %c0_26], %37 {strides = array<i32>} : memref<1x8x32xf32, #tpu.memory_space<vmem>>, vector<1x8x32xf32>,
    return
  }
  func.func @transform_0(%arg0: i32) -> (i32, i32, i32) {
    %c0_i32 = arith.constant 0 : i32
    %c0_i32_0 = arith.constant 0 : i32
    %c0_i32_1 = arith.constant 0 : i32
    return %arg0, %c0_i32, %c0_i32_0 : i32, i32, i32
  }
  func.func @transform_1(%arg0: i32) -> (i32, i32, i32) {
    %c0_i32 = arith.constant 0 : i32
    %c0_i32_0 = arith.constant 0 : i32
    %c0_i32_1 = arith.constant 0 : i32
    %c0_i32_2 = arith.constant 0 : i32
    return %c0_i32, %c0_i32_0, %c0_i32_1 : i32, i32, i32
  }
  func.func @transform_2(%arg0: i32) -> (i32, i32, i32) {
    %c0_i32 = arith.constant 0 : i32
    %c0_i32_0 = arith.constant 0 : i32
    %c0_i32_1 = arith.constant 0 : i32
    %c0_i32_2 = arith.constant 0 : i32
    return %c0_i32, %c0_i32_0, %c0_i32_1 : i32, i32, i32
  }
  func.func @transform_3(%arg0: i32) -> (i32, i32, i32) {
    %c0_i32 = arith.constant 0 : i32
    %c0_i32_0 = arith.constant 0 : i32
    %c0_i32_1 = arith.constant 0 : i32
    return %arg0, %c0_i32, %c0_i32_0 : i32, i32, i32
  }
}

module attributes {stable_mosaic.version = 11 : i64} {
  func.func @_self_attention_kernel(%arg0: i32, %arg1: memref<1x8x32xf32, #tpu.memory_space<vmem>>, %arg2: memref<3x32x32xf32, #tpu.memory_space<vmem>>, %arg3: memref<3x1x32xf32, #tpu.memory_space<vmem>>, %arg4: memref<1x8x32xf32, #tpu.memory_space<vmem>>) attributes {dimension_semantics = [#tpu.dimension_semantics<parallel>], iteration_bounds = array<i64: 2>, scalar_prefetch = 0 : i64, scratch_operands = 0 : i64, tpu.core_type = #tpu.core_type<tc>, window_params = [{transform_indices = @transform_0, window_bounds = array<i64: 1, 8, 32>}, {pipeline_mode = #tpu.pipeline_mode<synchronous>, transform_indices = @transform_1, window_bounds = array<i64: 3, 32, 32>}, {pipeline_mode = #tpu.pipeline_mode<synchronous>, transform_indices = @transform_2, window_bounds = array<i64: 3, 1, 32>}, {transform_indices = @transform_3, window_bounds = array<i64: 1, 8, 32>}]} {
    %c0 = arith.constant 0 : index
    %c0_0 = arith.constant 0 : index
    %c0_1 = arith.constant 0 : index
    %0 = vector.load %arg1[%c0, %c0_0, %c0_1] : memref<1x8x32xf32, #tpu.memory_space<vmem>>, vector<1x8x32xf32>
    %1 = vector.shape_cast %0 : vector<1x8x32xf32> to vector<8x32xf32>
    %c0_2 = arith.constant 0 : index
    %c0_3 = arith.constant 0 : index
    %c0_4 = arith.constant 0 : index
    %2 = vector.load %arg2[%c0_2, %c0_3, %c0_4] : memref<3x32x32xf32, #tpu.memory_space<vmem>>, vector<1x32x32xf32>
    %3 = vector.shape_cast %2 : vector<1x32x32xf32> to vector<32x32xf32>
    %cst = arith.constant dense<0.000000e+00> : vector<8x32xf32>
    %4 = tpu.matmul %1, %3, %cst {dimension_numbers = #tpu.dot_dimension_numbers<[1], [0], [0], [1], [0, 0, 1, 1], [], []>} : vector<8x32xf32>, vector<32x32xf32>, vector<8x32xf32> -> vector<8x32xf32>
    %c0_5 = arith.constant 0 : index
    %c0_6 = arith.constant 0 : index
    %c0_7 = arith.constant 0 : index
    %5 = vector.load %arg3[%c0_5, %c0_6, %c0_7] : memref<3x1x32xf32, #tpu.memory_space<vmem>>, vector<1x1x32xf32>
    %6 = vector.shape_cast %5 : vector<1x1x32xf32> to vector<1x32xf32>
    %7 = vector.broadcast %6 : vector<1x32xf32> to vector<8x32xf32>
    %8 = arith.addf %4, %7 : vector<8x32xf32>
    %9 = vector.shape_cast %8 : vector<8x32xf32> to vector<1x8x32xf32>
    %c1 = arith.constant 1 : index
    %c0_8 = arith.constant 0 : index
    %c0_9 = arith.constant 0 : index
    %10 = vector.load %arg2[%c1, %c0_8, %c0_9] : memref<3x32x32xf32, #tpu.memory_space<vmem>>, vector<1x32x32xf32>
    %11 = vector.shape_cast %10 : vector<1x32x32xf32> to vector<32x32xf32>
    %cst_10 = arith.constant dense<0.000000e+00> : vector<8x32xf32>
    %12 = tpu.matmul %1, %11, %cst_10 {dimension_numbers = #tpu.dot_dimension_numbers<[1], [0], [0], [1], [0, 0, 1, 1], [], []>} : vector<8x32xf32>, vector<32x32xf32>, vector<8x32xf32> -> vector<8x32xf32>
    %c1_11 = arith.constant 1 : index
    %c0_12 = arith.constant 0 : index
    %c0_13 = arith.constant 0 : index
    %13 = vector.load %arg3[%c1_11, %c0_12, %c0_13] : memref<3x1x32xf32, #tpu.memory_space<vmem>>, vector<1x1x32xf32>
    %14 = vector.shape_cast %13 : vector<1x1x32xf32> to vector<1x32xf32>
    %15 = vector.broadcast %14 : vector<1x32xf32> to vector<8x32xf32>
    %16 = arith.addf %12, %15 : vector<8x32xf32>
    %17 = vector.shape_cast %16 : vector<8x32xf32> to vector<1x8x32xf32>
    %c2 = arith.constant 2 : index
    %c0_14 = arith.constant 0 : index
    %c0_15 = arith.constant 0 : index
    %18 = vector.load %arg2[%c2, %c0_14, %c0_15] : memref<3x32x32xf32, #tpu.memory_space<vmem>>, vector<1x32x32xf32>
    %19 = vector.shape_cast %18 : vector<1x32x32xf32> to vector<32x32xf32>
    %cst_16 = arith.constant dense<0.000000e+00> : vector<8x32xf32>
    %20 = tpu.matmul %1, %19, %cst_16 {dimension_numbers = #tpu.dot_dimension_numbers<[1], [0], [0], [1], [0, 0, 1, 1], [], []>} : vector<8x32xf32>, vector<32x32xf32>, vector<8x32xf32> -> vector<8x32xf32>
    %c2_17 = arith.constant 2 : index
    %c0_18 = arith.constant 0 : index
    %c0_19 = arith.constant 0 : index
    %21 = vector.load %arg3[%c2_17, %c0_18, %c0_19] : memref<3x1x32xf32, #tpu.memory_space<vmem>>, vector<1x1x32xf32>
    %22 = vector.shape_cast %21 : vector<1x1x32xf32> to vector<1x32xf32>
    %23 = vector.broadcast %22 : vector<1x32xf32> to vector<8x32xf32>
    %24 = arith.addf %20, %23 : vector<8x32xf32>
    %25 = vector.shape_cast %24 : vector<8x32xf32> to vector<1x8x32xf32>
    "tpu.trace_start"() <{level = 10 : i32, message = "bqd,bkd->bqk"}> : () -> ()
    %cst_20 = arith.constant dense<0.000000e+00> : vector<1x8x8xf32>
    %26 = tpu.matmul %9, %17, %cst_20 {dimension_numbers = #tpu.dot_dimension_numbers<[2], [2], [1], [1], [0, 0, 0, 1, 1, 1], [0], [0]>} : vector<1x8x32xf32>, vector<1x8x32xf32>, vector<1x8x8xf32> -> vector<1x8x8xf32>
    "tpu.trace_stop"() : () -> ()
    %cst_21 = arith.constant dense<0xFF800000> : vector<1x8xf32>
    %27 = vector.multi_reduction <maximumf>, %26, %cst_21 [2] : vector<1x8x8xf32> to vector<1x8xf32>
    %28 = vector.shape_cast %27 : vector<1x8xf32> to vector<1x8x1xf32>
    %29 = vector.broadcast %28 : vector<1x8x1xf32> to vector<1x8x8xf32>
    %30 = arith.subf %26, %29 : vector<1x8x8xf32>
    %31 = math.exp %30 : vector<1x8x8xf32>
    %cst_22 = arith.constant dense<0.000000e+00> : vector<1x8xf32>
    %32 = vector.multi_reduction <add>, %31, %cst_22 [2] : vector<1x8x8xf32> to vector<1x8xf32>
    %33 = vector.shape_cast %32 : vector<1x8xf32> to vector<1x8x1xf32>
    "tpu.trace_start"() <{level = 10 : i32, message = "bqk,bkd->bqd"}> : () -> ()
    %cst_23 = arith.constant dense<0.000000e+00> : vector<1x8x32xf32>
    %34 = tpu.matmul %31, %25, %cst_23 {dimension_numbers = #tpu.dot_dimension_numbers<[2], [1], [1], [2], [0, 0, 0, 1, 1, 2], [0], [0]>} : vector<1x8x8xf32>, vector<1x8x32xf32>, vector<1x8x32xf32> -> vector<1x8x32xf32>
    "tpu.trace_stop"() : () -> ()
    %35 = tpu.reciprocal %33 : vector<1x8x1xf32> -> vector<1x8x1xf32>
    %36 = vector.broadcast %35 : vector<1x8x1xf32> to vector<1x8x32xf32>
    %37 = arith.mulf %34, %36 : vector<1x8x32xf32>
    %c0_24 = arith.constant 0 : index
    %c0_25 = arith.constant 0 : index
    %c0_26 = arith.constant 0 : index
    %38 = vector.load %arg4[%c0_24, %c0_25, %c0_26] : memref<1x8x32xf32, #tpu.memory_space<vmem>>, vector<1x8x32xf32>
    tpu.vector_store %arg4[%c0_24, %c0_25, %c0_26], %37 {strides = array<i32>} : memref<1x8x32xf32, #tpu.memory_space<vmem>>, vector<1x8x32xf32>,
    return
  }
  func.func @transform_0(%arg0: i32) -> (i32, i32, i32) {
    %c0_i32 = arith.constant 0 : i32
    %c0_i32_0 = arith.constant 0 : i32
    %c0_i32_1 = arith.constant 0 : i32
    return %arg0, %c0_i32, %c0_i32_0 : i32, i32, i32
  }
  func.func @transform_1(%arg0: i32) -> (i32, i32, i32) {
    %c0_i32 = arith.constant 0 : i32
    %c0_i32_0 = arith.constant 0 : i32
    %c0_i32_1 = arith.constant 0 : i32
    %c0_i32_2 = arith.constant 0 : i32
    return %c0_i32, %c0_i32_0, %c0_i32_1 : i32, i32, i32
  }
  func.func @transform_2(%arg0: i32) -> (i32, i32, i32) {
    %c0_i32 = arith.constant 0 : i32
    %c0_i32_0 = arith.constant 0 : i32
    %c0_i32_1 = arith.constant 0 : i32
    %c0_i32_2 = arith.constant 0 : i32
    return %c0_i32, %c0_i32_0, %c0_i32_1 : i32, i32, i32
  }
  func.func @transform_3(%arg0: i32) -> (i32, i32, i32) {
    %c0_i32 = arith.constant 0 : i32
    %c0_i32_0 = arith.constant 0 : i32
    %c0_i32_1 = arith.constant 0 : i32
    return %arg0, %c0_i32, %c0_i32_0 : i32, i32, i32
  }
}

</mosaic_0001>

<bundles_post_ra>
// kernel: tpu_custom_call.1
= control target key start
LH: loop header
LB: loop body
LE: loop exit
PB: predicated region body
PF: predicated region fallthrough
CT: control target
= control target key end

     0   :  { %8 = vsyncpa [#allocation3], 0  ;;  %s937_s0 = inlined_call_operand.hbm [shape: f32[2,8,32], index: 0, kind: input, shape index: {}]   ;;  %s938_s1 = inlined_call_operand.hbm [shape: f32[3,32,32], index: 1, kind: input, shape index: {}]   ;;  %s939_s2 = inlined_call_operand.hbm [shape: f32[3,1,32], index: 2, kind: input, shape index: {}]   ;;  %s940_s3 = inlined_call_operand.hbm [shape: f32[2,8,32], index: 3, kind: output, shape index: {}]  }
   0x1   :  { %10 = vsyncpa [#allocation3 + $0x1], 0 }
   0x2   :  { %11 = vsyncpa [#allocation6], 0 }
   0x3   :  { %12 = vsyncpa [#allocation4], 0 }
   0x4   :  { %14 = vsyncpa [#allocation4 + $0x1], 0  ;;  %s782_s12 = smov 0   ;;  %s784_s13 = smov 0  }
   0x5   :  { %s786_s14 = smov 0   ;;  %s788_s15 = smov 0  }
   0x6 LB: > { %s130_s18 = sshll.u32 %s938_s1, 4  ;;  %s806_s19 = sadd.s32 4294967295, %s754_s15   ;;  %s754_s15 = sphi %s788_s15, %s951_s15   ;;  %s750_s14 = sphi %s786_s14, %s950_s14   ;;  %s746_s13 = sphi %s784_s13, %s949_s13   ;;  %s742_s12 = sphi %s782_s12, %s948_s12   ;;  %s131_s18 = int_to_ptr.hbm [resolvable:$true] %s130_s18 }
   0x7   : > { %p495_p0 = scmp.ge.s32.totalorder %s754_s15, 1  ;;  %p41_p1 = scmp.eq.s32.totalorder %s806_s19, 0 }
   0x8   : > { %p119_p2 = scmp.lt.s32.totalorder %s754_s15, 3  ;;  %s756_s21 = smov [#allocation5]  }
   0x9   : > { %s132_s22 = sshll.u32 %s756_s21, 4  ;;  %s144_s25 = sshll.u32 %s939_s2, 4  ;;  %s133_s22 = int_to_ptr.vmem [resolvable:$true] %s132_s22  ;;  %s145_s25 = int_to_ptr.hbm [resolvable:$true] %s144_s25 }
   0xa   : > { %p811_p3 = pnand %p495_p0, %p119_p2  ;;  %s757_s26 = smov [#allocation7]  }
   0xb   : > { %s146_s27 = sshll.u32 %s757_s26, 4  ;;  %s758_s28 = smov 128   ;;  %s147_s27 = int_to_ptr.vmem [resolvable:$true] %s146_s27 }
   0xc   : > { %p528_p4 = pneg %p811_p3  ;;  %s759_s29 = smov 8  }
   0xd   : > { %s760_s30 = smov 16   ;;  %s761_s4 = smov 1  }
   0xe   : > { %p529_p6 = pnand %p528_p4, %p41_p1  ;;  %s494_s5 = sadd.s32 4294967294, %s754_s15  }
   0xf   : > { %s825_s6 = sadd.s32 1, %s754_s15   ;;  %s27_s8 = sadd.s32 1, %s750_s14 }
  0x10   : > { %531 = dma.hbm_to_vmem [thread:$0]  (!%p529_p6), %s131_s18, 1536, %s133_s22, [#allocation6], %s758_s28, %s758_s28, %s759_s29  }
  0x11   : > { %534 = dma.hbm_to_vmem [thread:$0]  (!%p529_p6), %s145_s25, 48, %s147_s27, [#allocation6], %s760_s30, %s760_s30, %s761_s4  }
  0x12   : > { %s24_s7 = ssub.s32 %s754_s15, %s825_s6  ;;  %p34_p8 = scmp.ne.s32.totalorder %s750_s14, %s746_s13 }
  0x13   : > { %p25_p7 = scmp.eq.s32.totalorder %s24_s7, 0  ;;  %p35_p9 = scmp.eq.s32.totalorder %s754_s15, 0 }
  0x14   : > { %p40_p10 = scmp.ne.s32.totalorder %s746_s13, %s742_s12  ;;  %p106_p13 = scmp.eq.s32.totalorder %s806_s19, 1 }
  0x15   : > { %s836_s9 = scalar_select %p25_p7, %s750_s14, %s27_s8  }
  0x16   : > { %p838_p11 = por %p35_p9, %p34_p8  ;;  %p844_p12 = por %p41_p1, %p40_p10 }
  0x17   : > { %p112_p0 = scmp.eq.s32.totalorder %s494_s5, 1  ;;  %p545_p2 = scmp.lt.s32.totalorder %s754_s15, 2 }
  0x18   : > { %s160_s16 = sand.u32 1, %s750_s14   ;;  %p851_p4 = por %p106_p13, %p34_p8 }
  0x19   : > { %p855_p6 = por %p112_p0, %p40_p10  ;;  %s499_s21 = sshll.u32 %s160_s16, 3 }
  0x1a   : > { %s500_s22 = sshll.u32 %s754_s15, 3  ;;  %s164_s26 = scalar_lea.vmem [#allocation2], %s499_s21 }
  0x1b   : > { %s168_s25 = scalar_lea.hbm %s937_s0, %s500_s22  ;;  %s172_s27 = sshll.u32 %s164_s26, 4  ;;  %s173_s27 = int_to_ptr.vmem [resolvable:$true] %s172_s27 }
  0x1c   : > { %s170_s28 = sshll.u32 %s168_s25, 4  ;;  %p865_p7 = pnand %p545_p2, %p838_p11  ;;  %s171_s28 = int_to_ptr.hbm [resolvable:$true] %s170_s28 }
  0x1d   : > { %s161_s30 = scalar_lea.sflag [#allocation3], %s160_s16  ;;  %s654_s4 = sshra.s32 %s171_s28, 4  ;;  %s655_s4 = int_to_ptr.hbm [resolvable:$true] %s654_s4 }
  0x1e   : > { %s656_s5 = scalar_lea.hbm %s655_s4, 8  ;;  %p658_p9 = pneg %p865_p7 }
  0x1f   : > { %p657_p8 = scmp.ne.s32.totalorder %s655_s4, %s656_s5  ;;  %s661_s21 = scalar_lea.hbm %s937_s0, 16 }
  0x20   : > { %p662_p11 = scmp.lt.s32.totalorder %s655_s4, %s937_s0  ;;  %p663_p0 = scmp.lt.s32.totalorder %s661_s21, %s656_s5 }
  0x21   : > { %p659_p10 = pnand %p658_p9, %p657_p8 }
  0x22   : > { %p664_p2 = por %p663_p0, %p662_p11 }
  0x23   : > { %p660_p13 = pneg %p659_p10 }
  0x25   : > { %p665_p5 = pnand %p664_p2, %p660_p13 }
  0x27   : > { %668 = shalt.err (!%p665_p5)
}
  0x28   : > { %538 = dma.hbm_to_vmem [thread:$0]  (!%p865_p7), %s171_s28, 128, %s173_s27, %s161_s30  }
  0x29   : > { %181 = sbr.rel (%p811_p3) target bundleno = 587 (0x24b), region = 32  ;;  %s882_s16 = sand.u32 (!%p811_p3), 1, %s746_s13  }
  0x2a   : > { %s502_s23 = sshll.u32 (!%p811_p3), %s882_s16, 3  ;;  %s184_s24 = scalar_lea.sflag (!%p811_p3), [#allocation3], %s882_s16 }
  0x2b   : > { %s187_s25 = scalar_lea.vmem (!%p811_p3), [#allocation2], %s502_s23 }
  0x2e   : > { %729 = dma.done.wait (%p844_p12), %s184_s24, 128  }
  0x2f   : > { %731 = vsyncadd (%p844_p12), %s184_s24, 4294967168 }
  0x30   : > { %733 = dma.done.wait (%p41_p1), [#allocation6], 1584  }
  0x31   : > { %735 = vsyncadd (%p41_p1), [#allocation6], 4294965712  ;;  %v258_v0 = vld [vmem:[#allocation5 + $0x38] sm:$0xff]  ;;  %v257_v1 = vld [vmem:[#allocation5 + $0x30] sm:$0xff]  ;;  %vm230_vm0 = vcmask 261120   ;;  %vm340_vm1 = vcmask 64512  }
  0x32   : > { %v225_v2 = vld [vmem:[#allocation5 + $0x18] sm:$0xff]  ;;  %276 = vmatpush.msra.mxu1 %v258_v0  ;;  %v224_v3 = vld [vmem:[#allocation5 + $0x10] sm:$0xff]  ;;  %v256_v4 = vld [vmem:[#allocation5 + $0x28] sm:$0xff]  ;;  %s513_s20 = sshll.u32 %s806_s19, 3  ;;  %s220_s28 = scalar_lea.vmem [#allocation8], %s502_s23 }
  0x33   : > { %246 = vmatpush.msra.mxu0 %v225_v2  ;;  %v223_v5 = vld [vmem:[#allocation5 + $0x8] sm:$0xff]  ;;  %v255_v6 = vld [vmem:[#allocation5 + $0x20] sm:$0xff]  ;;  %v221_v8 = vld [vmem:[%s187_s25] sm:$0xff]  ;;  %s400_s27 = scalar_lea.hbm %s940_s3, %s513_s20  ;;  %s402_s29 = sshll.u32 %s220_s28, 4  ;;  %s403_s29 = int_to_ptr.vmem [resolvable:$true] %s402_s29 }
  0x34   : > { %277 = vmatpush.msra.mxu1 %v257_v1  ;;  %v222_v7 = vld [vmem:[#allocation5] sm:$0xff]  ;;  %v288_v9 = vld [vmem:[#allocation5 + $0x58] sm:$0xff]  ;;  %v287_v10 = vld [vmem:[#allocation5 + $0x50] sm:$0xff]  ;;  %s404_s30 = sshll.u32 %s400_s27, 4  ;;  %s390_s19 = scalar_lea.sflag [#allocation4], %s882_s16  ;;  %s405_s30 = int_to_ptr.hbm [resolvable:$true] %s404_s30 }
  0x35   : > { %247 = vmatpush.msra.mxu0 %v224_v3  ;;  %306 = vmatpush.msra.mxu2 %v288_v9  ;;  %v286_v11 = vld [vmem:[#allocation5 + $0x48] sm:$0xff]  ;;  %v285_v12 = vld [vmem:[#allocation5 + $0x40] sm:$0xff]  ;;  %s698_s4 = sshra.s32 %s405_s30, 4  ;;  %s704_s21 = scalar_lea.hbm %s940_s3, 16  ;;  %s699_s4 = int_to_ptr.hbm [resolvable:$true] %s698_s4 }
  0x36   : > { %278 = vmatpush.msra.mxu1 %v256_v4  ;;  %v587_v13 = vld [vmem:[#allocation7 + $0x1] ss:$0 sm:$0xff]  ;;  %v588_v14 = vld [vmem:[#allocation7] ss:$0 sm:$0xff]  ;;  %v589_v21 = vld [vmem:[#allocation7 + $0x2] ss:$0 sm:$0xff]  ;;  %p705_p12 = scmp.lt.s32.totalorder %s699_s4, %s940_s3 }
  0x37   : > { %248 = vmatpush.msra.mxu0 %v223_v5  ;;  %307 = vmatpush.msra.mxu2 %v287_v10  ;;  %s700_s5 = scalar_lea.hbm %s699_s4, 8 }
  0x38   : > { %279 = vmatpush.msra.mxu1 %v255_v6  ;;  %p701_p1 = scmp.ne.s32.totalorder %s699_s4, %s700_s5  ;;  %p706_p7 = scmp.lt.s32.totalorder %s704_s21, %s700_s5 }
  0x39   : > { %249 = vmatpush.msra.mxu0 %v222_v7  ;;  %507 = vmatmul.msk.f32.vlgmr.msra.gmra.mxu1 %vm230_vm0, %v221_v8 }
  0x3a   : > { %506 = vmatmul.msk.f32.vlgmr.msra.gmra.mxu0 %vm230_vm0, %v221_v8  ;;  %308 = vmatpush.msra.mxu2 %v286_v11  ;;  %p702_p3 = pnand %p701_p1, %p851_p4  ;;  %p707_p8 = por %p706_p7, %p705_p12 }
  0x3c   : > { %309 = vmatpush.msra.mxu2 %v285_v12  ;;  %p703_p5 = pneg %p702_p3 }
  0x3d   : > { %508 = vmatmul.msk.f32.vlgmr.msra.gmra.mxu2 %vm230_vm0, %v221_v8 }
  0x3e   : > { %p708_p9 = pnand %p707_p8, %p703_p5 }
  0xb6   : > { %v281_v15 = vpop.f32.mrf.mxu1 }
  0xb7   : > { %v251_v16 = vpop.f32.mrf.mxu0  ;;  %v282_v17 = vadd.f32 %v587_v13, %v281_v15 }
  0xb8   : > { %v252_v18 = vadd.f32 %v588_v14, %v251_v16 }
  0xb9   : > { %509 = vmatpush.xpose.msk.msra.mxu3 %vm230_vm0, %v282_v17 }
  0xbc   : > { %510 = vmatmul.msk.f32.vlgmr.msra.gmra.mxu3 %vm230_vm0, %v252_v18 }
  0xc0   : > { %v311_v22 = vpop.f32.mrf.mxu2 }
  0xc1   : > { %v312_v23 = vadd.f32 %v589_v21, %v311_v22 }
  0xc3   : > { %368 = vmatpush.msrb.mxu3 %v312_v23 }
 0x13f   : > { %v337_v19 = vpop.f32.mrf.mxu3 }
 0x140   : > { %v341_v20 = vsel %vm340_vm1, %v337_v19, -inf }
 0x141   : > { %342 = vmax.xlane.f32.xlu0 %v341_v20 }
 0x1b4   : > { %v343_v24 = vpop.xlane.xlu0 %342 }
 0x1b5   : > { %v344_v25 = vsub.f32 %v337_v19, %v343_v24 }
 0x1b7   : > { %v345_v26 = vmul.f32 1.442695, %v344_v25 }
 0x1b9   : > { %590 = vpow2.f32 %v345_v26 }
 0x1bf   : > { %v591_v27 = vpop.eup %590 }
 0x1c0   : > { %511 = vmatmul.msk.f32.vlgmr.msrb.gmra.mxu3 %vm340_vm1, %v591_v27  ;;  %v347_v28 = vsel %vm340_vm1, %v591_v27, 0.0 }
 0x1c1   : > { %348 = vadd.xlane.f32.xlu0 %v347_v28 }
 0x234   : > { %v349_v29 = vpop.xlane.xlu0 %348 }
 0x235   : > { %592 = vrcp.f32 %v349_v29  ;;  %v384_v33 = vand.u32 2147483648, %v349_v29  ;;  %v382_v35 = vand.u32 2147483647, %v349_v29  ;;  %vm378_vm3 = vweird.f32 %v349_v29 }
 0x237   : > { %v385_v37 = vor.u32 1.1754944e-38, %v384_v33  ;;  %vm383_vm5 = vcmp.eq.f32.partialorder %v382_v35, 8.507059e+37 }
 0x23b   : > { %v593_v30 = vpop.eup %592 }
 0x23c   : > { %v374_v31 = vmul.f32 %v593_v30, %v349_v29  ;;  %vm379_vm2 = vweird.f32 %v593_v30 }
 0x23d   : > { %vm380_vm4 = vmor %vm378_vm3, %vm379_vm2 }
 0x23e   : > { %v375_v32 = vsub.f32 1.0, %v374_v31 }
 0x240   : > { %v376_v34 = vmul.f32 %v593_v30, %v375_v32 }
 0x242   : > { %v377_v36 = vadd.f32 %v593_v30, %v376_v34 }
 0x243   : > { %v370_v39 = vpop.f32.mrf.mxu3 }
 0x244   : > { %v381_v38 = vsel %vm380_vm4, %v593_v30, %v377_v36 }
 0x245   : > { %v386_v40 = vsel %vm383_vm5, %v385_v37, %v381_v38 }
 0x246   : > { %v387_v41 = vmul.f32 %v386_v40, %v370_v39 }
 0x248   : > { %388 = vst.msk [vmem:[%s220_s28] sm:$0xff] %vm230_vm0, %v387_v41 }
 0x249   : > { %711 = shalt.err (!%p708_p9)
}
 0x24a   : > { %526 = dma.vmem_to_hbm [thread:$0]  (%p851_p4), %s403_s29, 128, %s405_s30, %s390_s19  }
 0x24b PF: > { %s416_s16 = sand.u32 1, %s742_s12   ;;  %p947_p10 = scmp.ge.s32.totalorder %s754_s15, 2 }
 0x24c   : > { %s417_s23 = scalar_lea.sflag [#allocation4], %s416_s16 }
 0x24d   : > { %p540_p13 = pnand %p947_p10, %p855_p6 }
 0x24f   : > { %p541_p11 = pneg %p540_p13 }
 0x251   : > { %737 = dma.done.wait (%p541_p11), %s417_s23, 128  }
 0x252   : > { %739 = vsyncadd (%p541_p11), %s417_s23, 4294967168  ;;  %p17_p0 = scmp.ge.s32.totalorder %s825_s6, 4   ;;  %s948_s12 = smov %s746_s13 }
 0x253   : > { %s949_s13 = smov %s750_s14  ;;  %s950_s14 = smov %s836_s9 }
 0x254   : > { %s951_s15 = smov %s825_s6  ;;  %19 = sbr.rel (!%p17_p0) target bundleno = 6 (0x6), region = 89 }
 0x259   :  { %423 = vsyncpa [#allocation3], 1 }
 0x25a   :  { %425 = vsyncpa [#allocation3 + $0x1], 1 }
 0x25b   :  { %426 = vsyncpa [#allocation6], 1 }
 0x25c   :  { %427 = vsyncpa [#allocation4], 1 }
 0x25d   :  { %429 = vsyncpa [#allocation4 + $0x1], 1 }

// kernel: tpu_custom_call.1
= control target key start
LH: loop header
LB: loop body
LE: loop exit
PB: predicated region body
PF: predicated region fallthrough
CT: control target
= control target key end

     0   :  { %8 = vsyncpa [#allocation3], 0  ;;  %s937_s0 = inlined_call_operand.hbm [shape: f32[2,8,32], index: 0, kind: input, shape index: {}]   ;;  %s938_s1 = inlined_call_operand.hbm [shape: f32[3,32,32], index: 1, kind: input, shape index: {}]   ;;  %s939_s2 = inlined_call_operand.hbm [shape: f32[3,1,32], index: 2, kind: input, shape index: {}]   ;;  %s940_s3 = inlined_call_operand.hbm [shape: f32[2,8,32], index: 3, kind: output, shape index: {}]  }
   0x1   :  { %10 = vsyncpa [#allocation3 + $0x1], 0 }
   0x2   :  { %11 = vsyncpa [#allocation6], 0 }
   0x3   :  { %12 = vsyncpa [#allocation4], 0 }
   0x4   :  { %14 = vsyncpa [#allocation4 + $0x1], 0  ;;  %s782_s12 = smov 0   ;;  %s784_s13 = smov 0  }
   0x5   :  { %s786_s14 = smov 0   ;;  %s788_s15 = smov 0  }
   0x6 LB: > { %s130_s18 = sshll.u32 %s938_s1, 4  ;;  %s806_s19 = sadd.s32 4294967295, %s754_s15   ;;  %s754_s15 = sphi %s788_s15, %s951_s15   ;;  %s750_s14 = sphi %s786_s14, %s950_s14   ;;  %s746_s13 = sphi %s784_s13, %s949_s13   ;;  %s742_s12 = sphi %s782_s12, %s948_s12   ;;  %s131_s18 = int_to_ptr.hbm [resolvable:$true] %s130_s18 }
   0x7   : > { %p495_p0 = scmp.ge.s32.totalorder %s754_s15, 1  ;;  %p41_p1 = scmp.eq.s32.totalorder %s806_s19, 0 }
   0x8   : > { %p119_p2 = scmp.lt.s32.totalorder %s754_s15, 3  ;;  %s756_s21 = smov [#allocation5]  }
   0x9   : > { %s132_s22 = sshll.u32 %s756_s21, 4  ;;  %s144_s25 = sshll.u32 %s939_s2, 4  ;;  %s133_s22 = int_to_ptr.vmem [resolvable:$true] %s132_s22  ;;  %s145_s25 = int_to_ptr.hbm [resolvable:$true] %s144_s25 }
   0xa   : > { %p811_p3 = pnand %p495_p0, %p119_p2  ;;  %s757_s26 = smov [#allocation7]  }
   0xb   : > { %s146_s27 = sshll.u32 %s757_s26, 4  ;;  %s758_s28 = smov 128   ;;  %s147_s27 = int_to_ptr.vmem [resolvable:$true] %s146_s27 }
   0xc   : > { %p528_p4 = pneg %p811_p3  ;;  %s759_s29 = smov 8  }
   0xd   : > { %s760_s30 = smov 16   ;;  %s761_s4 = smov 1  }
   0xe   : > { %p529_p6 = pnand %p528_p4, %p41_p1  ;;  %s494_s5 = sadd.s32 4294967294, %s754_s15  }
   0xf   : > { %s825_s6 = sadd.s32 1, %s754_s15   ;;  %s27_s8 = sadd.s32 1, %s750_s14 }
  0x10   : > { %531 = dma.hbm_to_vmem [thread:$0]  (!%p529_p6), %s131_s18, 1536, %s133_s22, [#allocation6], %s758_s28, %s758_s28, %s759_s29  }
  0x11   : > { %534 = dma.hbm_to_vmem [thread:$0]  (!%p529_p6), %s145_s25, 48, %s147_s27, [#allocation6], %s760_s30, %s760_s30, %s761_s4  }
  0x12   : > { %s24_s7 = ssub.s32 %s754_s15, %s825_s6  ;;  %p34_p8 = scmp.ne.s32.totalorder %s750_s14, %s746_s13 }
  0x13   : > { %p25_p7 = scmp.eq.s32.totalorder %s24_s7, 0  ;;  %p35_p9 = scmp.eq.s32.totalorder %s754_s15, 0 }
  0x14   : > { %p40_p10 = scmp.ne.s32.totalorder %s746_s13, %s742_s12  ;;  %p106_p13 = scmp.eq.s32.totalorder %s806_s19, 1 }
  0x15   : > { %s836_s9 = scalar_select %p25_p7, %s750_s14, %s27_s8  }
  0x16   : > { %p838_p11 = por %p35_p9, %p34_p8  ;;  %p844_p12 = por %p41_p1, %p40_p10 }
  0x17   : > { %p112_p0 = scmp.eq.s32.totalorder %s494_s5, 1  ;;  %p545_p2 = scmp.lt.s32.totalorder %s754_s15, 2 }
  0x18   : > { %s160_s16 = sand.u32 1, %s750_s14   ;;  %p851_p4 = por %p106_p13, %p34_p8 }
  0x19   : > { %p855_p6 = por %p112_p0, %p40_p10  ;;  %s499_s21 = sshll.u32 %s160_s16, 3 }
  0x1a   : > { %s500_s22 = sshll.u32 %s754_s15, 3  ;;  %s164_s26 = scalar_lea.vmem [#allocation2], %s499_s21 }
  0x1b   : > { %s168_s25 = scalar_lea.hbm %s937_s0, %s500_s22  ;;  %s172_s27 = sshll.u32 %s164_s26, 4  ;;  %s173_s27 = int_to_ptr.vmem [resolvable:$true] %s172_s27 }
  0x1c   : > { %s170_s28 = sshll.u32 %s168_s25, 4  ;;  %p865_p7 = pnand %p545_p2, %p838_p11  ;;  %s171_s28 = int_to_ptr.hbm [resolvable:$true] %s170_s28 }
  0x1d   : > { %s161_s30 = scalar_lea.sflag [#allocation3], %s160_s16  ;;  %s654_s4 = sshra.s32 %s171_s28, 4  ;;  %s655_s4 = int_to_ptr.hbm [resolvable:$true] %s654_s4 }
  0x1e   : > { %s656_s5 = scalar_lea.hbm %s655_s4, 8  ;;  %p658_p9 = pneg %p865_p7 }
  0x1f   : > { %p657_p8 = scmp.ne.s32.totalorder %s655_s4, %s656_s5  ;;  %s661_s21 = scalar_lea.hbm %s937_s0, 16 }
  0x20   : > { %p662_p11 = scmp.lt.s32.totalorder %s655_s4, %s937_s0  ;;  %p663_p0 = scmp.lt.s32.totalorder %s661_s21, %s656_s5 }
  0x21   : > { %p659_p10 = pnand %p658_p9, %p657_p8 }
  0x22   : > { %p664_p2 = por %p663_p0, %p662_p11 }
  0x23   : > { %p660_p13 = pneg %p659_p10 }
  0x25   : > { %p665_p5 = pnand %p664_p2, %p660_p13 }
  0x27   : > { %668 = shalt.err (!%p665_p5)
}
  0x28   : > { %538 = dma.hbm_to_vmem [thread:$0]  (!%p865_p7), %s171_s28, 128, %s173_s27, %s161_s30  }
  0x29   : > { %181 = sbr.rel (%p811_p3) target bundleno = 587 (0x24b), region = 32  ;;  %s882_s16 = sand.u32 (!%p811_p3), 1, %s746_s13  }
  0x2a   : > { %s502_s23 = sshll.u32 (!%p811_p3), %s882_s16, 3  ;;  %s184_s24 = scalar_lea.sflag (!%p811_p3), [#allocation3], %s882_s16 }
  0x2b   : > { %s187_s25 = scalar_lea.vmem (!%p811_p3), [#allocation2], %s502_s23 }
  0x2e   : > { %729 = dma.done.wait (%p844_p12), %s184_s24, 128  }
  0x2f   : > { %731 = vsyncadd (%p844_p12), %s184_s24, 4294967168 }
  0x30   : > { %733 = dma.done.wait (%p41_p1), [#allocation6], 1584  }
  0x31   : > { %735 = vsyncadd (%p41_p1), [#allocation6], 4294965712  ;;  %v258_v0 = vld [vmem:[#allocation5 + $0x38] sm:$0xff]  ;;  %v257_v1 = vld [vmem:[#allocation5 + $0x30] sm:$0xff]  ;;  %vm230_vm0 = vcmask 261120   ;;  %vm340_vm1 = vcmask 64512  }
  0x32   : > { %v225_v2 = vld [vmem:[#allocation5 + $0x18] sm:$0xff]  ;;  %276 = vmatpush.msra.mxu1 %v258_v0  ;;  %v224_v3 = vld [vmem:[#allocation5 + $0x10] sm:$0xff]  ;;  %v256_v4 = vld [vmem:[#allocation5 + $0x28] sm:$0xff]  ;;  %s513_s20 = sshll.u32 %s806_s19, 3  ;;  %s220_s28 = scalar_lea.vmem [#allocation8], %s502_s23 }
  0x33   : > { %246 = vmatpush.msra.mxu0 %v225_v2  ;;  %v223_v5 = vld [vmem:[#allocation5 + $0x8] sm:$0xff]  ;;  %v255_v6 = vld [vmem:[#allocation5 + $0x20] sm:$0xff]  ;;  %v221_v8 = vld [vmem:[%s187_s25] sm:$0xff]  ;;  %s400_s27 = scalar_lea.hbm %s940_s3, %s513_s20  ;;  %s402_s29 = sshll.u32 %s220_s28, 4  ;;  %s403_s29 = int_to_ptr.vmem [resolvable:$true] %s402_s29 }
  0x34   : > { %277 = vmatpush.msra.mxu1 %v257_v1  ;;  %v222_v7 = vld [vmem:[#allocation5] sm:$0xff]  ;;  %v288_v9 = vld [vmem:[#allocation5 + $0x58] sm:$0xff]  ;;  %v287_v10 = vld [vmem:[#allocation5 + $0x50] sm:$0xff]  ;;  %s404_s30 = sshll.u32 %s400_s27, 4  ;;  %s390_s19 = scalar_lea.sflag [#allocation4], %s882_s16  ;;  %s405_s30 = int_to_ptr.hbm [resolvable:$true] %s404_s30 }
  0x35   : > { %247 = vmatpush.msra.mxu0 %v224_v3  ;;  %306 = vmatpush.msra.mxu2 %v288_v9  ;;  %v286_v11 = vld [vmem:[#allocation5 + $0x48] sm:$0xff]  ;;  %v285_v12 = vld [vmem:[#allocation5 + $0x40] sm:$0xff]  ;;  %s698_s4 = sshra.s32 %s405_s30, 4  ;;  %s704_s21 = scalar_lea.hbm %s940_s3, 16  ;;  %s699_s4 = int_to_ptr.hbm [resolvable:$true] %s698_s4 }
  0x36   : > { %278 = vmatpush.msra.mxu1 %v256_v4  ;;  %v587_v13 = vld [vmem:[#allocation7 + $0x1] ss:$0 sm:$0xff]  ;;  %v588_v14 = vld [vmem:[#allocation7] ss:$0 sm:$0xff]  ;;  %v589_v21 = vld [vmem:[#allocation7 + $0x2] ss:$0 sm:$0xff]  ;;  %p705_p12 = scmp.lt.s32.totalorder %s699_s4, %s940_s3 }
  0x37   : > { %248 = vmatpush.msra.mxu0 %v223_v5  ;;  %307 = vmatpush.msra.mxu2 %v287_v10  ;;  %s700_s5 = scalar_lea.hbm %s699_s4, 8 }
  0x38   : > { %279 = vmatpush.msra.mxu1 %v255_v6  ;;  %p701_p1 = scmp.ne.s32.totalorder %s699_s4, %s700_s5  ;;  %p706_p7 = scmp.lt.s32.totalorder %s704_s21, %s700_s5 }
  0x39   : > { %249 = vmatpush.msra.mxu0 %v222_v7  ;;  %507 = vmatmul.msk.f32.vlgmr.msra.gmra.mxu1 %vm230_vm0, %v221_v8 }
  0x3a   : > { %506 = vmatmul.msk.f32.vlgmr.msra.gmra.mxu0 %vm230_vm0, %v221_v8  ;;  %308 = vmatpush.msra.mxu2 %v286_v11  ;;  %p702_p3 = pnand %p701_p1, %p851_p4  ;;  %p707_p8 = por %p706_p7, %p705_p12 }
  0x3c   : > { %309 = vmatpush.msra.mxu2 %v285_v12  ;;  %p703_p5 = pneg %p702_p3 }
  0x3d   : > { %508 = vmatmul.msk.f32.vlgmr.msra.gmra.mxu2 %vm230_vm0, %v221_v8 }
  0x3e   : > { %p708_p9 = pnand %p707_p8, %p703_p5 }
  0xb6   : > { %v281_v15 = vpop.f32.mrf.mxu1 }
  0xb7   : > { %v251_v16 = vpop.f32.mrf.mxu0  ;;  %v282_v17 = vadd.f32 %v587_v13, %v281_v15 }
  0xb8   : > { %v252_v18 = vadd.f32 %v588_v14, %v251_v16 }
  0xb9   : > { %509 = vmatpush.xpose.msk.msra.mxu3 %vm230_vm0, %v282_v17 }
  0xbc   : > { %510 = vmatmul.msk.f32.vlgmr.msra.gmra.mxu3 %vm230_vm0, %v252_v18 }
  0xc0   : > { %v311_v22 = vpop.f32.mrf.mxu2 }
  0xc1   : > { %v312_v23 = vadd.f32 %v589_v21, %v311_v22 }
  0xc3   : > { %368 = vmatpush.msrb.mxu3 %v312_v23 }
 0x13f   : > { %v337_v19 = vpop.f32.mrf.mxu3 }
 0x140   : > { %v341_v20 = vsel %vm340_vm1, %v337_v19, -inf }
 0x141   : > { %342 = vmax.xlane.f32.xlu0 %v341_v20 }
 0x1b4   : > { %v343_v24 = vpop.xlane.xlu0 %342 }
 0x1b5   : > { %v344_v25 = vsub.f32 %v337_v19, %v343_v24 }
 0x1b7   : > { %v345_v26 = vmul.f32 1.442695, %v344_v25 }
 0x1b9   : > { %590 = vpow2.f32 %v345_v26 }
 0x1bf   : > { %v591_v27 = vpop.eup %590 }
 0x1c0   : > { %511 = vmatmul.msk.f32.vlgmr.msrb.gmra.mxu3 %vm340_vm1, %v591_v27  ;;  %v347_v28 = vsel %vm340_vm1, %v591_v27, 0.0 }
 0x1c1   : > { %348 = vadd.xlane.f32.xlu0 %v347_v28 }
 0x234   : > { %v349_v29 = vpop.xlane.xlu0 %348 }
 0x235   : > { %592 = vrcp.f32 %v349_v29  ;;  %v384_v33 = vand.u32 2147483648, %v349_v29  ;;  %v382_v35 = vand.u32 2147483647, %v349_v29  ;;  %vm378_vm3 = vweird.f32 %v349_v29 }
 0x237   : > { %v385_v37 = vor.u32 1.1754944e-38, %v384_v33  ;;  %vm383_vm5 = vcmp.eq.f32.partialorder %v382_v35, 8.507059e+37 }
 0x23b   : > { %v593_v30 = vpop.eup %592 }
 0x23c   : > { %v374_v31 = vmul.f32 %v593_v30, %v349_v29  ;;  %vm379_vm2 = vweird.f32 %v593_v30 }
 0x23d   : > { %vm380_vm4 = vmor %vm378_vm3, %vm379_vm2 }
 0x23e   : > { %v375_v32 = vsub.f32 1.0, %v374_v31 }
 0x240   : > { %v376_v34 = vmul.f32 %v593_v30, %v375_v32 }
 0x242   : > { %v377_v36 = vadd.f32 %v593_v30, %v376_v34 }
 0x243   : > { %v370_v39 = vpop.f32.mrf.mxu3 }
 0x244   : > { %v381_v38 = vsel %vm380_vm4, %v593_v30, %v377_v36 }
 0x245   : > { %v386_v40 = vsel %vm383_vm5, %v385_v37, %v381_v38 }
 0x246   : > { %v387_v41 = vmul.f32 %v386_v40, %v370_v39 }
 0x248   : > { %388 = vst.msk [vmem:[%s220_s28] sm:$0xff] %vm230_vm0, %v387_v41 }
 0x249   : > { %711 = shalt.err (!%p708_p9)
}
 0x24a   : > { %526 = dma.vmem_to_hbm [thread:$0]  (%p851_p4), %s403_s29, 128, %s405_s30, %s390_s19  }
 0x24b PF: > { %s416_s16 = sand.u32 1, %s742_s12   ;;  %p947_p10 = scmp.ge.s32.totalorder %s754_s15, 2 }
 0x24c   : > { %s417_s23 = scalar_lea.sflag [#allocation4], %s416_s16 }
 0x24d   : > { %p540_p13 = pnand %p947_p10, %p855_p6 }
 0x24f   : > { %p541_p11 = pneg %p540_p13 }
 0x251   : > { %737 = dma.done.wait (%p541_p11), %s417_s23, 128  }
 0x252   : > { %739 = vsyncadd (%p541_p11), %s417_s23, 4294967168  ;;  %p17_p0 = scmp.ge.s32.totalorder %s825_s6, 4   ;;  %s948_s12 = smov %s746_s13 }
 0x253   : > { %s949_s13 = smov %s750_s14  ;;  %s950_s14 = smov %s836_s9 }
 0x254   : > { %s951_s15 = smov %s825_s6  ;;  %19 = sbr.rel (!%p17_p0) target bundleno = 6 (0x6), region = 89 }
 0x259   :  { %423 = vsyncpa [#allocation3], 1 }
 0x25a   :  { %425 = vsyncpa [#allocation3 + $0x1], 1 }
 0x25b   :  { %426 = vsyncpa [#allocation6], 1 }
 0x25c   :  { %427 = vsyncpa [#allocation4], 1 }
 0x25d   :  { %429 = vsyncpa [#allocation4 + $0x1], 1 }

</bundles_post_ra>
